<compile_context>
chip_gen: v6e
topology: v6e:2x2x1
jax: 0.10.0
libtpu: 0.0.40
codegen_flags: <defaults>
</compile_context>

<pallas_src>
import functools

import jax
import jax.numpy as jnp
from jax import lax
from jax.experimental import pallas as pl
from jax.experimental.pallas import tpu as pltpu


def _cdiv(a, b):
    return (a + b - 1) // b


def _round_up(x, m):
    return _cdiv(x, m) * m


# --------------------------------------------------------------------------- #
# Kernels
# --------------------------------------------------------------------------- #
def _gcn_single_block_kernel(adj_ref, emb_ref, out_ref, *, compute_dtype):
    a = adj_ref[...].astype(compute_dtype)
    b = emb_ref[...].astype(compute_dtype)
    out_ref[...] = jnp.dot(a, b, preferred_element_type=jnp.float32)


def _gcn_tiled_kernel(rd_ref, adj_ref, emb_ref, out_ref, *, compute_dtype):
    i = pl.program_id(0)
    k = pl.program_id(2)
    nk = pl.num_programs(2)

    # Output tile is VMEM-resident across the K axis (out BlockSpec constant in k):
    # zero it on the first K step and accumulate directly into it.
    @pl.when(k == 0)
    def _zero():
        out_ref[...] = jnp.zeros_like(out_ref)

    # A block is nonzero iff its redirect entry points at itself. The same redirect
    # table drives the index_maps, so all-zero blocks re-use the previous DMA
    # (no data movement) and here we also skip the MXU work.
    @pl.when(rd_ref[i * nk + k] == k)
    def _accumulate():
        a = adj_ref[...].astype(compute_dtype)
        b = emb_ref[...].astype(compute_dtype)   # f32 -> bf16 cast fused in-kernel
        out_ref[...] += jnp.dot(a, b, preferred_element_type=jnp.float32)


# --------------------------------------------------------------------------- #
# One-time (per graph) adjacency preprocessing — cache and reuse across layers.
# --------------------------------------------------------------------------- #
def preprocess_adjacency(adj, *, tm=1024, tk=1024, use_bf16=True,
                         ensure_two_row_blocks=True):
    """Cast/pad the (static) adjacency once and build the block-sparsity redirect
    table. The returned dict is reused by every gcn_layer call on this graph."""
    M, K = adj.shape
    adj_dtype = jnp.bfloat16 if use_bf16 else jnp.float32

    tm = min(_round_up(tm, 8), _round_up(M, 8))
    if ensure_two_row_blocks and M >= 256:
        # keep at least 2 row blocks so the "parallel" axis can split across
        # v7x's two TensorCores.
        tm = min(tm, _round_up(_cdiv(M, 2), 8))
    tk = min(_round_up(tk, 128), _round_up(K, 128))

    Mp, Kp = _round_up(M, tm), _round_up(K, tk)
    adj_c = adj.astype(adj_dtype)
    if (Mp, Kp) != (M, K):
        adj_c = jnp.pad(adj_c, ((0, Mp - M), (0, Kp - K)))

    n_i, n_k = Mp // tm, Kp // tk

    # Per-(i,k) "adjacency block has any nonzero" flags, turned into a redirect
    # table: redirect[i,k] = k               if block (i,k) is nonzero
    #                      = last nonzero k' <= k (else first nonzero k' > k, else 0)
    # so consecutive zero blocks keep the same block index => Pallas elides the DMA.
    nz = (adj_c != 0).reshape(n_i, tm, n_k, tk).any(axis=(1, 3))          # (n_i, n_k)
    k_idx = jnp.arange(n_k, dtype=jnp.int32)[None, :]
    prev = lax.cummax(jnp.where(nz, k_idx, -1), axis=1)
    nxt = lax.cummin(jnp.where(nz, k_idx, n_k), axis=1, reverse=True)
    redirect = jnp.where(prev >= 0, prev, jnp.where(nxt < n_k, nxt, 0))
    redirect = redirect.astype(jnp.int32).reshape(-1)                     # SMEM table

    return {
        "adj": adj_c, "redirect": redirect,
        "M": M, "K": K, "Mp": Mp, "Kp": Kp,
        "tm": tm, "tk": tk, "n_i": n_i, "n_k": n_k,
    }


# --------------------------------------------------------------------------- #
# GCN layer: out = adj @ embeds   (torch.spmm semantics, dense-with-block-skip)
# --------------------------------------------------------------------------- #
def gcn_layer(adj, embeds, *, adj_state=None, tm=1024, tk=1024, use_bf16=True,
              force_tiled=False, fast_path_bytes=24 << 20):
    """Pallas equivalent of GCNLayer.forward: adj @ embeds.

    Pass `adj_state=preprocess_adjacency(adj, ...)` to reuse the cached / padded /
    block-analyzed adjacency across layers and steps (the graph is static)."""
    if adj_state is not None:
        M, K = adj_state["M"], adj_state["K"]
    else:
        M, K = adj.shape
    K2, N = embeds.shape
    assert K == K2, "adj columns must match embeds rows"

    out_dtype = jnp.float32
    compute_dtype = jnp.bfloat16 if use_bf16 else jnp.float32
    comp_item = 2 if use_bf16 else 4

    # ---- Small-problem fast path: single block, f32 inputs, cast fused in-kernel.
    if adj_state is None and not force_tiled:
        adj_item = adj.dtype.itemsize
        emb_item = embeds.dtype.itemsize
        need = (M * K * adj_item + K * N * emb_item          # f32 inputs in VMEM
                + (M * K + K * N) * comp_item                # in-kernel bf16 copies
                + M * N * 4)                                 # f32 output
        if need <= fast_path_bytes:
            vmem_limit = min(max(32 << 20, int(need * 1.25) + (2 << 20)), 64 << 20)
            return pl.pallas_call(
                functools.partial(_gcn_single_block_kernel,
                                  compute_dtype=compute_dtype),
                out_shape=jax.ShapeDtypeStruct((M, N), out_dtype),
                grid=(1,),
                in_specs=[
                    pl.BlockSpec((M, K), lambda i: (0, 0)),
                    pl.BlockSpec((K, N), lambda i: (0, 0)),
                ],
                out_specs=pl.BlockSpec((M, N), lambda i: (0, 0)),
                compiler_params=pltpu.CompilerParams(vmem_limit_bytes=vmem_limit),
                cost_estimate=pl.CostEstimate(
                    flops=2 * M * N * K, transcendentals=0, bytes_accessed=need),
            )(adj, embeds)

    # ---- Tiled path (cached adjacency + block-sparse DMA/compute skip). ----
    if adj_state is None:
        adj_state = preprocess_adjacency(adj, tm=tm, tk=tk, use_bf16=use_bf16)

    adj_c = adj_state["adj"]
    redirect = adj_state["redirect"]
    tm, tk = adj_state["tm"], adj_state["tk"]
    Mp, Kp = adj_state["Mp"], adj_state["Kp"]
    n_i, n_k = adj_state["n_i"], adj_state["n_k"]
    compute_dtype = adj_c.dtype                   # match cached adjacency dtype
    adj_item = adj_c.dtype.itemsize

    emb = embeds
    if Kp != K:                                   # only pad when tiles don't divide
        emb = jnp.pad(emb, ((0, Kp - K), (0, 0)))
    emb_item = emb.dtype.itemsize

    # tn == full N keeps n_j == 1 (embeds streamed once per row block) and needs no
    # column padding (full-dim blocks are exempt from the 128-lane divisibility rule).
    grid = (n_i, 1, n_k)

    def adj_map(i, j, k, rd):
        return (i, rd[i * n_k + k])               # zero block -> previous index -> no DMA

    def emb_map(i, j, k, rd):
        return (rd[i * n_k + k], 0)

    def out_map(i, j, k, rd):
        return (i, j)                             # constant in k -> VMEM-resident acc

    bufs = 3
    need = (bufs * (tm * tk * adj_item + tk * N * emb_item)   # multi-buffered inputs
            + 2 * tm * N * 4                                  # output tile (f32)
            + tk * N * comp_item                              # in-kernel bf16 copy
            + (2 << 20))
    vmem_limit = min(max(32 << 20, int(need * 1.25)), 64 << 20)

    out = pl.pallas_call(
        functools.partial(_gcn_tiled_kernel, compute_dtype=compute_dtype),
        out_shape=jax.ShapeDtypeStruct((Mp, N), out_dtype),
        grid_spec=pltpu.PrefetchScalarGridSpec(
            num_scalar_prefetch=1,
            grid=grid,
            in_specs=[
                pl.BlockSpec((tm, tk), adj_map, pipeline_mode=pl.Buffered(bufs)),
                pl.BlockSpec((tk, N), emb_map, pipeline_mode=pl.Buffered(bufs)),
            ],
            out_specs=pl.BlockSpec((tm, N), out_map),
        ),
        compiler_params=pltpu.CompilerParams(
            dimension_semantics=("parallel", "parallel", "arbitrary"),
            vmem_limit_bytes=vmem_limit,
        ),
        cost_estimate=pl.CostEstimate(
            flops=2 * Mp * N * Kp,
            transcendentals=0,
            bytes_accessed=(Mp * Kp * adj_item          # adjacency read once
                            + n_i * Kp * N * emb_item   # embeds re-read per row block
                            + Mp * N * 4),              # output written once
        ),
    )(redirect, adj_c, emb)

    return out if Mp == M else out[:M]


def _bf16_reference(adj, embeds):
    """Reference matching the kernel's bf16-input / f32-accumulate math."""
    a = adj.astype(jnp.bfloat16).astype(jnp.float32)
    b = embeds.astype(jnp.bfloat16).astype(jnp.float32)
    return jnp.dot(a, b, precision=lax.Precision.HIGHEST)


if __name__ == "__main__":
    key = jax.random.PRNGKey(0)
    k_adj, k_emb, k_adj2, k_emb2 = jax.random.split(key, 4)

    # ---- Case 1: small graph (256 nodes, 128-dim) -> single-block fast path. ----
    n_nodes, d_hidden = 256, 128
    raw = jax.random.uniform(k_adj, (n_nodes, n_nodes), dtype=jnp.float32)
    adj = jnp.where(raw > 0.9, raw, 0.0)                      # ~90% sparse
    embeds = jax.random.normal(k_emb, (n_nodes, d_hidden), dtype=jnp.float32)

    out = jax.block_until_ready(gcn_layer(adj, embeds))
    assert out.shape == (n_nodes, d_hidden)
    assert jnp.allclose(out, _bf16_reference(adj, embeds), atol=1e-2, rtol=1e-3)
    assert jnp.allclose(out, adj @ embeds, atol=2e-1, rtol=1e-1)   # loose f32 check

    # ---- Case 2: ragged sizes, tiled path, cached adjacency reused across two
    #      "layers", with an all-zero adjacency block exercising the DMA skip. ----
    n2, d2 = 640, 192
    raw2 = jax.random.uniform(k_adj2, (n2, n2), dtype=jnp.float32)
    adj2 = jnp.where(raw2 > 0.9, raw2, 0.0)
    adj2 = adj2.at[:512, 512:].set(0.0)           # carve an all-zero block
    emb2 = jax.random.normal(k_emb2, (n2, d2), dtype=jnp.float32)

    state = preprocess_adjacency(adj2, tm=320, tk=256)   # cached once per graph
    h1 = jax.block_until_ready(gcn_layer(adj2, emb2, adj_state=state))
    h2 = jax.block_until_ready(gcn_layer(adj2, h1, adj_state=state))   # reuse cache
    assert h1.shape == (n2, d2) and h2.shape == (n2, d2)
    assert jnp.allclose(h1, _bf16_reference(adj2, emb2), atol=1e-2, rtol=1e-3)
    assert jnp.allclose(h1, adj2 @ emb2, atol=2.5e-1, rtol=1e-1)       # loose f32 check
    assert jnp.allclose(h2, _bf16_reference(adj2, h1), atol=5e-2, rtol=1e-3)

    print("KERNEL_OK")
</pallas_src>

<mosaic_0001>
module attributes {stable_mosaic.version = 11 : i64} {
  func.func @_gcn_single_block_kernel(%arg0: i32, %arg1: memref<256x256xf32, #tpu.memory_space<vmem>>, %arg2: memref<256x128xf32, #tpu.memory_space<vmem>>, %arg3: memref<256x128xf32, #tpu.memory_space<vmem>>) attributes {dimension_semantics = [#tpu.dimension_semantics<arbitrary>], iteration_bounds = array<i64: 1>, scalar_prefetch = 0 : i64, scratch_operands = 0 : i64, tpu.core_type = #tpu.core_type<tc>, window_params = [{pipeline_mode = #tpu.pipeline_mode<synchronous>, transform_indices = @transform_0, window_bounds = array<i64: 256, 256>}, {pipeline_mode = #tpu.pipeline_mode<synchronous>, transform_indices = @transform_1, window_bounds = array<i64: 256, 128>}, {pipeline_mode = #tpu.pipeline_mode<synchronous>, transform_indices = @transform_2, window_bounds = array<i64: 256, 128>}]} {
    %c0 = arith.constant 0 : index
    %c0_0 = arith.constant 0 : index
    %0 = vector.load %arg1[%c0, %c0_0] : memref<256x256xf32, #tpu.memory_space<vmem>>, vector<256x256xf32>
    %1 = arith.truncf %0 : vector<256x256xf32> to vector<256x256xbf16>
    %c0_1 = arith.constant 0 : index
    %c0_2 = arith.constant 0 : index
    %2 = vector.load %arg2[%c0_1, %c0_2] : memref<256x128xf32, #tpu.memory_space<vmem>>, vector<256x128xf32>
    %3 = arith.truncf %2 : vector<256x128xf32> to vector<256x128xbf16>
    %cst = arith.constant dense<0.000000e+00> : vector<256x128xf32>
    %4 = tpu.matmul %1, %3, %cst {dimension_numbers = #tpu.dot_dimension_numbers<[1], [0], [0], [1], [0, 0, 1, 1], [], []>} : vector<256x256xbf16>, vector<256x128xbf16>, vector<256x128xf32> -> vector<256x128xf32>
    %c0_3 = arith.constant 0 : index
    %c0_4 = arith.constant 0 : index
    %5 = vector.load %arg3[%c0_3, %c0_4] : memref<256x128xf32, #tpu.memory_space<vmem>>, vector<256x128xf32>
    tpu.vector_store %arg3[%c0_3, %c0_4], %4 {strides = array<i32>} : memref<256x128xf32, #tpu.memory_space<vmem>>, vector<256x128xf32>,
    return
  }
  func.func @transform_0(%arg0: i32) -> (i32, i32) {
    %c0_i32 = arith.constant 0 : i32
    %c0_i32_0 = arith.constant 0 : i32
    %c0_i32_1 = arith.constant 0 : i32
    return %c0_i32, %c0_i32_0 : i32, i32
  }
  func.func @transform_1(%arg0: i32) -> (i32, i32) {
    %c0_i32 = arith.constant 0 : i32
    %c0_i32_0 = arith.constant 0 : i32
    %c0_i32_1 = arith.constant 0 : i32
    return %c0_i32, %c0_i32_0 : i32, i32
  }
  func.func @transform_2(%arg0: i32) -> (i32, i32) {
    %c0_i32 = arith.constant 0 : i32
    %c0_i32_0 = arith.constant 0 : i32
    %c0_i32_1 = arith.constant 0 : i32
    return %c0_i32, %c0_i32_0 : i32, i32
  }
}

</mosaic_0001>

<bundles_post_ra>
// kernel: tpu_custom_call.1
= control target key start
LH: loop header
LB: loop body
LE: loop exit
PB: predicated region body
PF: predicated region fallthrough
CT: control target
= control target key end

     0   :  { %7 = vsyncpa [#allocation3], 0  ;;  %s634_s0 = inlined_call_operand.hbm [shape: f32[256,256], index: 0, kind: input, shape index: {}]   ;;  %s635_s1 = inlined_call_operand.hbm [shape: f32[256,128], index: 1, kind: input, shape index: {}]   ;;  %s636_s2 = inlined_call_operand.hbm [shape: f32[256,128], index: 2, kind: output, shape index: {}]  }
   0x1   :  { %8 = vsyncpa [#allocation6], 0 }
   0x2   :  { %9 = vsyncpa [#allocation4], 0  ;;  %s597_s9 = smov [#allocation2]  }
   0x3   :  { %s15_s10 = sshll.u32 %s597_s9, 4  ;;  %s16_s10 = int_to_ptr.vmem [resolvable:$true] %s15_s10 }
   0x4   :  { %s539_s11 = scalar_lea.vmem %s16_s10, 8192  ;;  %p544_p1 = scmp.lt.s32.totalorder %s16_s10, %s16_s10 }
   0x5   :  { %p540_p0 = scmp.ne.s32.totalorder %s16_s10, %s539_s11  ;;  %p545_p2 = scmp.lt.s32.totalorder %s539_s11, %s539_s11 }
   0x7   :  { %p546_p3 = por %p545_p2, %p544_p1 }
   0x9   :  { %p547_p4 = pnand %p546_p3, %p540_p0 }
   0xb   :  { %550 = shalt.err (!%p547_p4)
}
   0xc   :  { %s598_s12 = smov 256   ;;  %s599_s13 = smov 16  }
   0xd   :  { %21 = dma.hbm_to_vmem [thread:$0]  %s634_s0, 8192, %s16_s10, [#allocation3], %s598_s12, %s598_s12, %s599_s13  }
   0xe   :  { %s600_s16 = smov [#allocation5]  }
   0xf   :  { %s27_s17 = sshll.u32 %s600_s16, 4  ;;  %s28_s17 = int_to_ptr.vmem [resolvable:$true] %s27_s17 }
  0x10   :  { %s559_s18 = scalar_lea.vmem %s28_s17, 4096  ;;  %p564_p6 = scmp.lt.s32.totalorder %s28_s17, %s28_s17 }
  0x11   :  { %p560_p5 = scmp.ne.s32.totalorder %s28_s17, %s559_s18  ;;  %p565_p7 = scmp.lt.s32.totalorder %s559_s18, %s559_s18 }
  0x13   :  { %p566_p8 = por %p565_p7, %p564_p6 }
  0x15   :  { %p567_p9 = pnand %p566_p8, %p560_p5 }
  0x17   :  { %570 = shalt.err (!%p567_p9)
}
  0x18   :  { %s601_s19 = smov 128   ;;  %s602_s20 = smov 8  }
  0x19   :  { %33 = dma.hbm_to_vmem [thread:$0]  %s635_s1, 4096, %s28_s17, [#allocation6], %s601_s19, %s601_s19, %s602_s20  }
  0x1a   :  { %591 = dma.done.wait [#allocation3], 8192  }
  0x1b   :  { %592 = vsyncadd [#allocation3], 4294959104 }
  0x1c   :  { %593 = dma.done.wait [#allocation6], 4096  }
  0x1d   :  { %594 = vsyncadd [#allocation6], 4294963200  ;;  %v167_v0 = vld [vmem:[#allocation5 + $0xf0] sm:$0xff]  ;;  %v168_v1 = vld [vmem:[#allocation5 + $0xf8] sm:$0xff]  ;;  %s603_s0 = smov [#allocation7]  }
  0x1e   :  { %v151_v2 = vld [vmem:[#allocation5 + $0x70] sm:$0xff]  ;;  %v184_v3 = vpack.c.bf16 %v168_v1, %v167_v0  ;;  %v152_v4 = vld [vmem:[#allocation5 + $0x78] sm:$0xff]  ;;  %v165_v5 = vld [vmem:[#allocation5 + $0xe0] sm:$0xff]  ;;  %s383_s1 = sshll.u32 %s603_s0, 4  ;;  %s384_s1 = int_to_ptr.vmem [resolvable:$true] %s383_s1 }
  0x1f   :  { %v166_v6 = vld [vmem:[#allocation5 + $0xe8] sm:$0xff]  ;;  %v176_v7 = vpack.c.bf16 %v152_v4, %v151_v2  ;;  %v149_v9 = vld [vmem:[#allocation5 + $0x60] sm:$0xff]  ;;  %v163_v11 = vld [vmem:[#allocation5 + $0xd0] sm:$0xff]  ;;  %s571_s23 = scalar_lea.vmem %s384_s1, 4096  ;;  %p576_p11 = scmp.lt.s32.totalorder %s384_s1, %s384_s1 }
  0x20   :  { %v183_v8 = vpack.c.bf16 %v166_v6, %v165_v5  ;;  %v150_v10 = vld [vmem:[#allocation5 + $0x68] sm:$0xff]  ;;  %396 = vmatprep.subr.bf16.mxu0 %v184_v3  ;;  %508 = vmatprep.subr.bf16.mxu1 %v184_v3  ;;  %v164_v12 = vld [vmem:[#allocation5 + $0xd8] sm:$0xff]  ;;  %v147_v15 = vld [vmem:[#allocation5 + $0x50] sm:$0xff]  ;;  %p572_p10 = scmp.ne.s32.totalorder %s384_s1, %s571_s23  ;;  %p577_p12 = scmp.lt.s32.totalorder %s571_s23, %s571_s23 }
  0x21   :  { %397 = vmatpush3.bf16.msra.mxu0 %v176_v7  ;;  %516 = vmatpush3.bf16.msra.mxu1 %v176_v7  ;;  %v175_v13 = vpack.c.bf16 %v150_v10, %v149_v9  ;;  %v182_v14 = vpack.c.bf16 %v164_v12, %v163_v11  ;;  %v148_v16 = vld [vmem:[#allocation5 + $0x58] sm:$0xff]  ;;  %v161_v17 = vld [vmem:[#allocation5 + $0xc0] sm:$0xff]  ;;  %v162_v18 = vld [vmem:[#allocation5 + $0xc8] sm:$0xff] }
  0x22   :  { %398 = vmatprep.subr.bf16.mxu0 %v183_v8  ;;  %509 = vmatprep.subr.bf16.mxu1 %v183_v8  ;;  %v174_v19 = vpack.c.bf16 %v148_v16, %v147_v15  ;;  %v181_v20 = vpack.c.bf16 %v162_v18, %v161_v17  ;;  %v145_v21 = vld [vmem:[#allocation5 + $0x40] sm:$0xff]  ;;  %v146_v22 = vld [vmem:[#allocation5 + $0x48] sm:$0xff]  ;;  %v159_v23 = vld [vmem:[#allocation5 + $0xb0] sm:$0xff]  ;;  %p578_p13 = por %p577_p12, %p576_p11 }
  0x23   :  { %v160_v24 = vld [vmem:[#allocation5 + $0xb8] sm:$0xff]  ;;  %v42_v25 = vld [vmem:[#allocation2 + $0x8] sm:$0xff]  ;;  %v173_v29 = vpack.c.bf16 %v146_v22, %v145_v21  ;;  %v143_v33 = vld [vmem:[#allocation5 + $0x30] sm:$0xff] }
  0x24   :  { %v44_v26 = vld [vmem:[#allocation2 + $0x18] sm:$0xff]  ;;  %v74_v27 = vld [vmem:[#allocation2 + $0x108] sm:$0xff]  ;;  %v180_v32 = vpack.c.bf16 %v160_v24, %v159_v23  ;;  %v157_v35 = vld [vmem:[#allocation5 + $0xa0] sm:$0xff]  ;;  %p579_p0 = pnand %p578_p13, %p572_p10 }
  0x25   :  { %399 = vmatpush3.bf16.msra.mxu0 %v175_v13  ;;  %517 = vmatpush3.bf16.msra.mxu1 %v175_v13  ;;  %v76_v28 = vld [vmem:[#allocation2 + $0x118] sm:$0xff]  ;;  %v106_v30 = vpack.c.bf16 %v44_v26, %v42_v25  ;;  %v158_v36 = vld [vmem:[#allocation5 + $0xa8] sm:$0xff]  ;;  %v141_v39 = vld [vmem:[#allocation5 + $0x20] sm:$0xff] }
  0x26   :  { %400 = vmatprep.subr.bf16.mxu0 %v182_v14  ;;  %510 = vmatprep.subr.bf16.mxu1 %v182_v14  ;;  %v122_v31 = vpack.c.bf16 %v76_v28, %v74_v27  ;;  %v144_v34 = vld [vmem:[#allocation5 + $0x38] sm:$0xff]  ;;  %v179_v38 = vpack.c.bf16 %v158_v36, %v157_v35  ;;  %v142_v40 = vld [vmem:[#allocation5 + $0x28] sm:$0xff]  ;;  %v155_v41 = vld [vmem:[#allocation5 + $0x90] sm:$0xff] }
  0x27   :  { %217 = vmatprep.mubr.bf16.mxu0 %v106_v30  ;;  %v172_v37 = vpack.c.bf16 %v144_v34, %v143_v33  ;;  %v156_v42 = vld [vmem:[#allocation5 + $0x98] sm:$0xff]  ;;  %v171_v43 = vpack.c.bf16 %v142_v40, %v141_v39  ;;  %v139_v45 = vld [vmem:[#allocation5 + $0x10] sm:$0xff]  ;;  %v153_v47 = vld [vmem:[#allocation5 + $0x80] sm:$0xff] }
  0x28   :  { %281 = vmatprep.mubr.bf16.mxu1 %v122_v31  ;;  %v178_v44 = vpack.c.bf16 %v156_v42, %v155_v41  ;;  %v140_v46 = vld [vmem:[#allocation5 + $0x18] sm:$0xff]  ;;  %v154_v48 = vld [vmem:[#allocation5 + $0x88] sm:$0xff]  ;;  %v137_v51 = vld [vmem:[#allocation5] sm:$0xff] }
  0x29   :  { %401 = vmatpush3.bf16.msra.mxu0 %v174_v19  ;;  %518 = vmatpush3.bf16.msra.mxu1 %v174_v19  ;;  %v170_v49 = vpack.c.bf16 %v140_v46, %v139_v45  ;;  %v177_v50 = vpack.c.bf16 %v154_v48, %v153_v47  ;;  %v138_v52 = vld [vmem:[#allocation5 + $0x8] sm:$0xff]  ;;  %v41_v53 = vld [vmem:[#allocation2] sm:$0xff]  ;;  %v43_v54 = vld [vmem:[#allocation2 + $0x10] sm:$0xff] }
  0x2a   :  { %402 = vmatprep.subr.bf16.mxu0 %v181_v20  ;;  %511 = vmatprep.subr.bf16.mxu1 %v181_v20  ;;  %v169_v55 = vpack.c.bf16 %v138_v52, %v137_v51  ;;  %v73_v56 = vld [vmem:[#allocation2 + $0x100] sm:$0xff]  ;;  %v75_v57 = vld [vmem:[#allocation2 + $0x110] sm:$0xff]  ;;  %v46_v58 = vld [vmem:[#allocation2 + $0x28] sm:$0xff]  ;;  %v105_v62 = vpack.c.bf16 %v43_v54, %v41_v53 }
  0x2b   :  { %v48_v59 = vld [vmem:[#allocation2 + $0x38] sm:$0xff]  ;;  %v78_v60 = vld [vmem:[#allocation2 + $0x128] sm:$0xff]  ;;  %v121_v63 = vpack.c.bf16 %v75_v57, %v73_v56  ;;  %v45_v2 = vld [vmem:[#allocation2 + $0x20] sm:$0xff] }
  0x2c   :  { %v80_v61 = vld [vmem:[#allocation2 + $0x138] sm:$0xff]  ;;  %v108_v0 = vpack.c.bf16 %v48_v59, %v46_v58  ;;  %v47_v3 = vld [vmem:[#allocation2 + $0x30] sm:$0xff]  ;;  %v77_v4 = vld [vmem:[#allocation2 + $0x120] sm:$0xff] }
  0x2d   :  { %403 = vmatpush3.bf16.msra.mxu0 %v173_v29  ;;  %519 = vmatpush3.bf16.msra.mxu1 %v173_v29  ;;  %v124_v1 = vpack.c.bf16 %v80_v61, %v78_v60  ;;  %v79_v5 = vld [vmem:[#allocation2 + $0x130] sm:$0xff]  ;;  %v50_v6 = vld [vmem:[#allocation2 + $0x48] sm:$0xff]  ;;  %v52_v7 = vld [vmem:[#allocation2 + $0x58] sm:$0xff]  ;;  %v107_v10 = vpack.c.bf16 %v47_v3, %v45_v2 }
  0x2e   :  { %404 = vmatprep.subr.bf16.mxu0 %v180_v32  ;;  %512 = vmatprep.subr.bf16.mxu1 %v180_v32  ;;  %v82_v8 = vld [vmem:[#allocation2 + $0x148] sm:$0xff]  ;;  %v84_v9 = vld [vmem:[#allocation2 + $0x158] sm:$0xff]  ;;  %v123_v11 = vpack.c.bf16 %v79_v5, %v77_v4  ;;  %v110_v12 = vpack.c.bf16 %v52_v7, %v50_v6  ;;  %v49_v14 = vld [vmem:[#allocation2 + $0x40] sm:$0xff] }
  0x2f   :  { %v126_v13 = vpack.c.bf16 %v84_v9, %v82_v8  ;;  %v51_v15 = vld [vmem:[#allocation2 + $0x50] sm:$0xff]  ;;  %v81_v16 = vld [vmem:[#allocation2 + $0x140] sm:$0xff]  ;;  %v54_v18 = vld [vmem:[#allocation2 + $0x68] sm:$0xff] }
  0x30   :  { %v83_v17 = vld [vmem:[#allocation2 + $0x150] sm:$0xff]  ;;  %v56_v19 = vld [vmem:[#allocation2 + $0x78] sm:$0xff]  ;;  %v86_v20 = vld [vmem:[#allocation2 + $0x168] sm:$0xff]  ;;  %v109_v22 = vpack.c.bf16 %v51_v15, %v49_v14 }
  0x31   :  { %405 = vmatpush3.bf16.msra.mxu0 %v172_v37  ;;  %520 = vmatpush3.bf16.msra.mxu1 %v172_v37  ;;  %v88_v21 = vld [vmem:[#allocation2 + $0x178] sm:$0xff]  ;;  %v125_v23 = vpack.c.bf16 %v83_v17, %v81_v16  ;;  %v112_v24 = vpack.c.bf16 %v56_v19, %v54_v18  ;;  %v53_v26 = vld [vmem:[#allocation2 + $0x60] sm:$0xff]  ;;  %v55_v27 = vld [vmem:[#allocation2 + $0x70] sm:$0xff] }
  0x32   :  { %406 = vmatprep.subr.bf16.mxu0 %v179_v38  ;;  %513 = vmatprep.subr.bf16.mxu1 %v179_v38  ;;  %v128_v25 = vpack.c.bf16 %v88_v21, %v86_v20  ;;  %v85_v28 = vld [vmem:[#allocation2 + $0x160] sm:$0xff]  ;;  %v87_v29 = vld [vmem:[#allocation2 + $0x170] sm:$0xff]  ;;  %v58_v30 = vld [vmem:[#allocation2 + $0x88] sm:$0xff]  ;;  %v111_v34 = vpack.c.bf16 %v55_v27, %v53_v26 }
  0x33   :  { %v60_v31 = vld [vmem:[#allocation2 + $0x98] sm:$0xff]  ;;  %v90_v32 = vld [vmem:[#allocation2 + $0x188] sm:$0xff]  ;;  %v127_v35 = vpack.c.bf16 %v87_v29, %v85_v28  ;;  %v57_v38 = vld [vmem:[#allocation2 + $0x80] sm:$0xff] }
  0x34   :  { %v92_v33 = vld [vmem:[#allocation2 + $0x198] sm:$0xff]  ;;  %v114_v36 = vpack.c.bf16 %v60_v31, %v58_v30  ;;  %v59_v39 = vld [vmem:[#allocation2 + $0x90] sm:$0xff]  ;;  %v89_v40 = vld [vmem:[#allocation2 + $0x180] sm:$0xff] }
  0x35   :  { %407 = vmatpush3.bf16.msra.mxu0 %v171_v43  ;;  %521 = vmatpush3.bf16.msra.mxu1 %v171_v43  ;;  %v130_v37 = vpack.c.bf16 %v92_v33, %v90_v32  ;;  %v91_v41 = vld [vmem:[#allocation2 + $0x190] sm:$0xff]  ;;  %v62_v42 = vld [vmem:[#allocation2 + $0xa8] sm:$0xff]  ;;  %v64_v43 = vld [vmem:[#allocation2 + $0xb8] sm:$0xff]  ;;  %v113_v46 = vpack.c.bf16 %v59_v39, %v57_v38 }
  0x36   :  { %408 = vmatprep.subr.bf16.mxu0 %v178_v44  ;;  %514 = vmatprep.subr.bf16.mxu1 %v178_v44  ;;  %v94_v44 = vld [vmem:[#allocation2 + $0x1a8] sm:$0xff]  ;;  %v96_v45 = vld [vmem:[#allocation2 + $0x1b8] sm:$0xff]  ;;  %v129_v47 = vpack.c.bf16 %v91_v41, %v89_v40  ;;  %v116_v48 = vpack.c.bf16 %v64_v43, %v62_v42  ;;  %v63_v51 = vld [vmem:[#allocation2 + $0xb0] sm:$0xff] }
  0x37   :  { %v93_v52 = vld [vmem:[#allocation2 + $0x1a0] sm:$0xff]  ;;  %v95_v53 = vld [vmem:[#allocation2 + $0x1b0] sm:$0xff]  ;;  %v66_v54 = vld [vmem:[#allocation2 + $0xc8] sm:$0xff] }
  0x38   :  { %v98_v56 = vld [vmem:[#allocation2 + $0x1c8] sm:$0xff]  ;;  %v100_v57 = vld [vmem:[#allocation2 + $0x1d8] sm:$0xff]  ;;  %v131_v59 = vpack.c.bf16 %v95_v53, %v93_v52 }
  0x39   :  { %409 = vmatpush3.bf16.msra.mxu0 %v170_v49  ;;  %522 = vmatpush3.bf16.msra.mxu1 %v170_v49  ;;  %v132_v49 = vpack.c.bf16 %v96_v45, %v94_v44  ;;  %v134_v61 = vpack.c.bf16 %v100_v57, %v98_v56  ;;  %v70_v2 = vld [vmem:[#allocation2 + $0xe8] sm:$0xff]  ;;  %v72_v3 = vld [vmem:[#allocation2 + $0xf8] sm:$0xff] }
  0x3a   :  { %410 = vmatprep.subr.bf16.mxu0 %v177_v50  ;;  %515 = vmatprep.subr.bf16.mxu1 %v177_v50  ;;  %v61_v50 = vld [vmem:[#allocation2 + $0xa0] sm:$0xff]  ;;  %v102_v4 = vld [vmem:[#allocation2 + $0x1e8] sm:$0xff]  ;;  %v104_v5 = vld [vmem:[#allocation2 + $0x1f8] sm:$0xff]  ;;  %v120_v8 = vpack.c.bf16 %v72_v3, %v70_v2 }
  0x3b   :  { %v115_v58 = vpack.c.bf16 %v63_v51, %v61_v50  ;;  %v136_v9 = vpack.c.bf16 %v104_v5, %v102_v4 }
  0x3d   :  { %411 = vmatpush3.bf16.msra.mxu0 %v169_v55  ;;  %523 = vmatpush3.bf16.msra.mxu1 %v169_v55  ;;  %v68_v55 = vld [vmem:[#allocation2 + $0xd8] sm:$0xff] }
  0x3e   :  { %v118_v60 = vpack.c.bf16 %v68_v55, %v66_v54 }
  0x40   :  { %218 = vmatmul.mubr.bf16.vlgmr.msra.gmra.mxu0 %v105_v62  ;;  %282 = vmatmul.mubr.bf16.vlgmr.msra.gmra.mxu1 %v121_v63  ;;  %v65_v62 = vld [vmem:[#allocation2 + $0xc0] sm:$0xff]  ;;  %v67_v63 = vld [vmem:[#allocation2 + $0xd0] sm:$0xff] }
  0x41   :  { %225 = vmatprep.mubr.bf16.mxu0 %v108_v0  ;;  %289 = vmatprep.mubr.bf16.mxu1 %v124_v1  ;;  %v97_v0 = vld [vmem:[#allocation2 + $0x1c0] sm:$0xff]  ;;  %v99_v1 = vld [vmem:[#allocation2 + $0x1d0] sm:$0xff]  ;;  %v117_v6 = vpack.c.bf16 %v67_v63, %v65_v62 }
  0x42   :  { %v133_v7 = vpack.c.bf16 %v99_v1, %v97_v0 }
  0x48   :  { %226 = vmatmul.mubr.bf16.gmra.mxu0 %v107_v10  ;;  %290 = vmatmul.mubr.bf16.gmra.mxu1 %v123_v11  ;;  %v69_v10 = vld [vmem:[#allocation2 + $0xe0] sm:$0xff]  ;;  %v71_v11 = vld [vmem:[#allocation2 + $0xf0] sm:$0xff] }
  0x49   :  { %233 = vmatprep.mubr.bf16.mxu0 %v110_v12  ;;  %297 = vmatprep.mubr.bf16.mxu1 %v126_v13  ;;  %v101_v12 = vld [vmem:[#allocation2 + $0x1e0] sm:$0xff]  ;;  %v103_v13 = vld [vmem:[#allocation2 + $0x1f0] sm:$0xff]  ;;  %v119_v14 = vpack.c.bf16 %v71_v11, %v69_v10 }
  0x4a   :  { %v135_v15 = vpack.c.bf16 %v103_v13, %v101_v12 }
  0x50   :  { %234 = vmatmul.mubr.bf16.gmra.mxu0 %v109_v22  ;;  %298 = vmatmul.mubr.bf16.gmra.mxu1 %v125_v23 }
  0x51   :  { %241 = vmatprep.mubr.bf16.mxu0 %v112_v24  ;;  %305 = vmatprep.mubr.bf16.mxu1 %v128_v25 }
  0x58   :  { %242 = vmatmul.mubr.bf16.gmra.mxu0 %v111_v34  ;;  %306 = vmatmul.mubr.bf16.gmra.mxu1 %v127_v35 }
  0x59   :  { %249 = vmatprep.mubr.bf16.mxu0 %v114_v36  ;;  %313 = vmatprep.mubr.bf16.mxu1 %v130_v37 }
  0x60   :  { %250 = vmatmul.mubr.bf16.gmra.mxu0 %v113_v46  ;;  %314 = vmatmul.mubr.bf16.gmra.mxu1 %v129_v47 }
  0x61   :  { %257 = vmatprep.mubr.bf16.mxu0 %v116_v48  ;;  %321 = vmatprep.mubr.bf16.mxu1 %v132_v49 }
  0x68   :  { %258 = vmatmul.mubr.bf16.gmra.mxu0 %v115_v58  ;;  %322 = vmatmul.mubr.bf16.gmra.mxu1 %v131_v59 }
  0x69   :  { %265 = vmatprep.mubr.bf16.mxu0 %v118_v60  ;;  %329 = vmatprep.mubr.bf16.mxu1 %v134_v61 }
  0x70   :  { %266 = vmatmul.mubr.bf16.gmra.mxu0 %v117_v6  ;;  %330 = vmatmul.mubr.bf16.gmra.mxu1 %v133_v7 }
  0x71   :  { %273 = vmatprep.mubr.bf16.mxu0 %v120_v8  ;;  %337 = vmatprep.mubr.bf16.mxu1 %v136_v9 }
  0x78   :  { %274 = vmatmul.mubr.bf16.gmra.mxu0 %v119_v14  ;;  %338 = vmatmul.mubr.bf16.gmra.mxu1 %v135_v15 }
 0x100   :  { %v412_v16 = vpop.f32.mrf.mxu0  ;;  %v460_v17 = vpop.f32.mrf.mxu1 }
 0x102   :  { %v413_v18 = vpop.f32.mrf.mxu0  ;;  %v461_v19 = vpop.f32.mrf.mxu1 }
 0x103   :  { %v414_v20 = vadd.f32 %v413_v18, %v412_v16  ;;  %v462_v21 = vadd.f32 %v461_v19, %v460_v17 }
 0x104   :  { %v415_v22 = vpop.f32.mrf.mxu0  ;;  %v463_v23 = vpop.f32.mrf.mxu1 }
 0x105   :  { %346 = vst [vmem:[#allocation7] sm:$0xff] %v414_v20  ;;  %362 = vst [vmem:[#allocation7 + $0x80] sm:$0xff] %v462_v21 }
 0x106   :  { %v416_v24 = vpop.f32.mrf.mxu0  ;;  %v464_v25 = vpop.f32.mrf.mxu1 }
 0x107   :  { %v417_v26 = vadd.f32 %v416_v24, %v415_v22  ;;  %v465_v27 = vadd.f32 %v464_v25, %v463_v23 }
 0x108   :  { %v418_v28 = vpop.f32.mrf.mxu0  ;;  %v466_v29 = vpop.f32.mrf.mxu1 }
 0x109   :  { %347 = vst [vmem:[#allocation7 + $0x8] sm:$0xff] %v417_v26  ;;  %363 = vst [vmem:[#allocation7 + $0x88] sm:$0xff] %v465_v27 }
 0x10a   :  { %v419_v30 = vpop.f32.mrf.mxu0  ;;  %v467_v31 = vpop.f32.mrf.mxu1 }
 0x10b   :  { %v420_v32 = vadd.f32 %v419_v30, %v418_v28  ;;  %v468_v33 = vadd.f32 %v467_v31, %v466_v29 }
 0x10c   :  { %v421_v34 = vpop.f32.mrf.mxu0  ;;  %v469_v35 = vpop.f32.mrf.mxu1 }
 0x10d   :  { %348 = vst [vmem:[#allocation7 + $0x10] sm:$0xff] %v420_v32  ;;  %364 = vst [vmem:[#allocation7 + $0x90] sm:$0xff] %v468_v33 }
 0x10e   :  { %v422_v36 = vpop.f32.mrf.mxu0  ;;  %v470_v37 = vpop.f32.mrf.mxu1 }
 0x10f   :  { %v423_v38 = vadd.f32 %v422_v36, %v421_v34  ;;  %v471_v39 = vadd.f32 %v470_v37, %v469_v35 }
 0x110   :  { %v424_v40 = vpop.f32.mrf.mxu0  ;;  %v472_v41 = vpop.f32.mrf.mxu1 }
 0x111   :  { %349 = vst [vmem:[#allocation7 + $0x18] sm:$0xff] %v423_v38  ;;  %365 = vst [vmem:[#allocation7 + $0x98] sm:$0xff] %v471_v39 }
 0x112   :  { %v425_v42 = vpop.f32.mrf.mxu0  ;;  %v473_v43 = vpop.f32.mrf.mxu1 }
 0x113   :  { %v426_v44 = vadd.f32 %v425_v42, %v424_v40  ;;  %v474_v45 = vadd.f32 %v473_v43, %v472_v41 }
 0x114   :  { %v427_v46 = vpop.f32.mrf.mxu0  ;;  %v475_v47 = vpop.f32.mrf.mxu1 }
 0x115   :  { %350 = vst [vmem:[#allocation7 + $0x20] sm:$0xff] %v426_v44  ;;  %366 = vst [vmem:[#allocation7 + $0xa0] sm:$0xff] %v474_v45 }
 0x116   :  { %v428_v48 = vpop.f32.mrf.mxu0  ;;  %v476_v49 = vpop.f32.mrf.mxu1 }
 0x117   :  { %v429_v50 = vadd.f32 %v428_v48, %v427_v46  ;;  %v477_v51 = vadd.f32 %v476_v49, %v475_v47 }
 0x118   :  { %v430_v52 = vpop.f32.mrf.mxu0  ;;  %v478_v53 = vpop.f32.mrf.mxu1 }
 0x119   :  { %351 = vst [vmem:[#allocation7 + $0x28] sm:$0xff] %v429_v50  ;;  %367 = vst [vmem:[#allocation7 + $0xa8] sm:$0xff] %v477_v51 }
 0x11a   :  { %v431_v54 = vpop.f32.mrf.mxu0  ;;  %v479_v55 = vpop.f32.mrf.mxu1 }
 0x11b   :  { %v432_v56 = vadd.f32 %v431_v54, %v430_v52  ;;  %v480_v57 = vadd.f32 %v479_v55, %v478_v53 }
 0x11c   :  { %v433_v58 = vpop.f32.mrf.mxu0  ;;  %v481_v59 = vpop.f32.mrf.mxu1 }
 0x11d   :  { %352 = vst [vmem:[#allocation7 + $0x30] sm:$0xff] %v432_v56  ;;  %368 = vst [vmem:[#allocation7 + $0xb0] sm:$0xff] %v480_v57 }
 0x11e   :  { %v434_v60 = vpop.f32.mrf.mxu0  ;;  %v482_v61 = vpop.f32.mrf.mxu1 }
 0x11f   :  { %v435_v62 = vadd.f32 %v434_v60, %v433_v58  ;;  %v483_v63 = vadd.f32 %v482_v61, %v481_v59 }
 0x120   :  { %v436_v0 = vpop.f32.mrf.mxu0  ;;  %v484_v1 = vpop.f32.mrf.mxu1 }
 0x121   :  { %353 = vst [vmem:[#allocation7 + $0x38] sm:$0xff] %v435_v62  ;;  %369 = vst [vmem:[#allocation7 + $0xb8] sm:$0xff] %v483_v63 }
 0x122   :  { %v437_v2 = vpop.f32.mrf.mxu0  ;;  %v485_v3 = vpop.f32.mrf.mxu1 }
 0x123   :  { %v438_v4 = vadd.f32 %v437_v2, %v436_v0  ;;  %v486_v5 = vadd.f32 %v485_v3, %v484_v1 }
 0x124   :  { %v439_v6 = vpop.f32.mrf.mxu0  ;;  %v487_v7 = vpop.f32.mrf.mxu1 }
 0x125   :  { %354 = vst [vmem:[#allocation7 + $0x40] sm:$0xff] %v438_v4  ;;  %370 = vst [vmem:[#allocation7 + $0xc0] sm:$0xff] %v486_v5 }
 0x126   :  { %v440_v8 = vpop.f32.mrf.mxu0  ;;  %v488_v9 = vpop.f32.mrf.mxu1 }
 0x127   :  { %v441_v10 = vadd.f32 %v440_v8, %v439_v6  ;;  %v489_v11 = vadd.f32 %v488_v9, %v487_v7 }
 0x128   :  { %v442_v12 = vpop.f32.mrf.mxu0  ;;  %v490_v13 = vpop.f32.mrf.mxu1 }
 0x129   :  { %355 = vst [vmem:[#allocation7 + $0x48] sm:$0xff] %v441_v10  ;;  %371 = vst [vmem:[#allocation7 + $0xc8] sm:$0xff] %v489_v11 }
 0x12a   :  { %v443_v14 = vpop.f32.mrf.mxu0  ;;  %v491_v15 = vpop.f32.mrf.mxu1 }
 0x12b   :  { %v444_v16 = vadd.f32 %v443_v14, %v442_v12  ;;  %v492_v17 = vadd.f32 %v491_v15, %v490_v13 }
 0x12c   :  { %v445_v18 = vpop.f32.mrf.mxu0  ;;  %v493_v19 = vpop.f32.mrf.mxu1 }
 0x12d   :  { %356 = vst [vmem:[#allocation7 + $0x50] sm:$0xff] %v444_v16  ;;  %372 = vst [vmem:[#allocation7 + $0xd0] sm:$0xff] %v492_v17 }
 0x12e   :  { %v446_v20 = vpop.f32.mrf.mxu0  ;;  %v494_v21 = vpop.f32.mrf.mxu1 }
 0x12f   :  { %v447_v22 = vadd.f32 %v446_v20, %v445_v18  ;;  %v495_v23 = vadd.f32 %v494_v21, %v493_v19 }
 0x130   :  { %v448_v24 = vpop.f32.mrf.mxu0  ;;  %v496_v25 = vpop.f32.mrf.mxu1 }
 0x131   :  { %357 = vst [vmem:[#allocation7 + $0x58] sm:$0xff] %v447_v22  ;;  %373 = vst [vmem:[#allocation7 + $0xd8] sm:$0xff] %v495_v23 }
 0x132   :  { %v449_v26 = vpop.f32.mrf.mxu0  ;;  %v497_v27 = vpop.f32.mrf.mxu1 }
 0x133   :  { %v450_v28 = vadd.f32 %v449_v26, %v448_v24  ;;  %v498_v29 = vadd.f32 %v497_v27, %v496_v25 }
 0x134   :  { %v451_v30 = vpop.f32.mrf.mxu0  ;;  %v499_v31 = vpop.f32.mrf.mxu1 }
 0x135   :  { %358 = vst [vmem:[#allocation7 + $0x60] sm:$0xff] %v450_v28  ;;  %374 = vst [vmem:[#allocation7 + $0xe0] sm:$0xff] %v498_v29 }
 0x136   :  { %v452_v32 = vpop.f32.mrf.mxu0  ;;  %v500_v33 = vpop.f32.mrf.mxu1 }
 0x137   :  { %v453_v34 = vadd.f32 %v452_v32, %v451_v30  ;;  %v501_v35 = vadd.f32 %v500_v33, %v499_v31 }
 0x138   :  { %v454_v36 = vpop.f32.mrf.mxu0  ;;  %v502_v37 = vpop.f32.mrf.mxu1 }
 0x139   :  { %359 = vst [vmem:[#allocation7 + $0x68] sm:$0xff] %v453_v34  ;;  %375 = vst [vmem:[#allocation7 + $0xe8] sm:$0xff] %v501_v35 }
 0x13a   :  { %v455_v38 = vpop.f32.mrf.mxu0  ;;  %v503_v39 = vpop.f32.mrf.mxu1 }
 0x13b   :  { %v456_v40 = vadd.f32 %v455_v38, %v454_v36  ;;  %v504_v41 = vadd.f32 %v503_v39, %v502_v37 }
 0x13c   :  { %v457_v42 = vpop.f32.mrf.mxu0  ;;  %v505_v43 = vpop.f32.mrf.mxu1 }
 0x13d   :  { %360 = vst [vmem:[#allocation7 + $0x70] sm:$0xff] %v456_v40  ;;  %376 = vst [vmem:[#allocation7 + $0xf0] sm:$0xff] %v504_v41 }
 0x13e   :  { %v458_v44 = vpop.f32.mrf.mxu0  ;;  %v506_v45 = vpop.f32.mrf.mxu1 }
 0x13f   :  { %v459_v46 = vadd.f32 %v458_v44, %v457_v42  ;;  %v507_v47 = vadd.f32 %v506_v45, %v505_v43 }
 0x141   :  { %361 = vst [vmem:[#allocation7 + $0x78] sm:$0xff] %v459_v46  ;;  %377 = vst [vmem:[#allocation7 + $0xf8] sm:$0xff] %v507_v47 }
 0x142   :  { %582 = shalt.err (!%p579_p0)
}
 0x143   :  { %389 = dma.vmem_to_hbm [thread:$0]  %s384_s1, 4096, %s636_s2, [#allocation4], %s601_s19, %s601_s19, %s602_s20  }
 0x144   :  { %595 = dma.done.wait [#allocation4], 4096  }
 0x145   :  { %596 = vsyncadd [#allocation4], 4294963200 }
 0x146   :  { %393 = vsyncpa [#allocation3], 1 }
 0x147   :  { %394 = vsyncpa [#allocation6], 1 }
 0x148   :  { %395 = vsyncpa [#allocation4], 1 }

</bundles_post_ra>
